<compile_context>
chip_gen: v5e
topology: v5e:2x2
jax: 0.10.0
libtpu: 0.0.40
codegen_flags: <defaults>
</compile_context>

<pallas_src>
import numpy as np
import jax
import jax.numpy as jnp
from jax.experimental import pallas as pl
from jax.experimental.pallas import tpu as pltpu


def _round_up(x, m):
    return ((x + m - 1) // m) * m


def skip_kernel(idx_ref, emb_ref, w_ref, b_ref, out_ref, embed_ref):
    # idx_ref:   (TN, 1)  int32   token indices for this token tile
    # emb_ref:   (Vp, D)  bf16    zero-padded embedding table (grid-resident block)
    # w_ref:     (TV, D)  bf16    linear weight tile, native (out, in) layout
    # b_ref:     (1, TV)  f32     linear bias tile
    # out_ref:   (TN, TV) f32     logits tile
    # embed_ref: (TN, D)  bf16    VMEM scratch: gathered embeddings for token tile i
    tn = idx_ref.shape[0]
    vp = emb_ref.shape[0]

    @pl.when(pl.program_id(1) == 0)
    def _gather():
        # One-hot gather expressed as an MXU matmul:
        #   onehot[t, v] = (idx[t] == v);  embed = onehot @ emb -> (TN, D)
        vocab_iota = jax.lax.broadcasted_iota(jnp.int32, (tn, vp), 1)
        onehot = (idx_ref[...] == vocab_iota).astype(jnp.bfloat16)
        gathered = jax.lax.dot_general(
            onehot, emb_ref[...],
            (((1,), (0,)), ((), ())),
            preferred_element_type=jnp.float32)
        embed_ref[...] = gathered.astype(jnp.bfloat16)  # exact: one-hot select

    # Linear: (TN, D) contracted with (TV, D) on D -> (TN, TV), f32 accumulation,
    # without materializing a transposed weight anywhere.
    logits = jax.lax.dot_general(
        embed_ref[...], w_ref[...],
        (((1,), (1,)), ((), ())),
        preferred_element_type=jnp.float32)
    out_ref[...] = logits + b_ref[...]


def skip_forward(x, embedding, lin_w, lin_b, *, tn=128, tv=512):
    """x: int array (any shape); embedding: (V, D); lin_w: (V, D); lin_b: (V,)."""
    V, D = embedding.shape
    orig_shape = x.shape

    # ---- pad to MXU / lane friendly multiples -----------------------------
    tv = min(tv, _round_up(V, 128))   # vocab tile, multiple of 128
    Vp = _round_up(V, tv)             # lane-dense, divisible by tv
    idx_flat = x.reshape(-1).astype(jnp.int32)
    N = idx_flat.shape[0]
    Np = _round_up(max(N, 1), tn)     # fill MXU sublane rows
    n_i = Np // tn
    n_j = Vp // tv

    idx_pad = jnp.pad(idx_flat, (0, Np - N)).reshape(Np, 1)        # pad with idx 0
    emb_pad = jnp.pad(embedding, ((0, Vp - V), (0, 0))).astype(jnp.bfloat16)
    w_pad = jnp.pad(lin_w, ((0, Vp - V), (0, 0))).astype(jnp.bfloat16)
    b_pad = jnp.pad(lin_b, (0, Vp - V)).astype(jnp.float32).reshape(1, Vp)

    # Advisory cost hint for XLA scheduling around the custom call.
    flops = 2 * Np * Vp * D          # one-hot gather (per token tile, summed)
    flops += 2 * Np * Vp * D         # linear
    bytes_accessed = (idx_pad.size * 4 + emb_pad.size * 2
                      + n_i * (w_pad.size * 2 + b_pad.size * 4)
                      + Np * Vp * 4)
    cost = pl.CostEstimate(flops=flops, transcendentals=0,
                           bytes_accessed=bytes_accessed)

    out = pl.pallas_call(
        skip_kernel,
        out_shape=jax.ShapeDtypeStruct((Np, Vp), jnp.float32),
        grid_spec=pltpu.PrefetchScalarGridSpec(
            num_scalar_prefetch=0,
            grid=(n_i, n_j),
            in_specs=[
                pl.BlockSpec((tn, 1), lambda i, j: (i, 0)),    # token indices
                pl.BlockSpec((Vp, D), lambda i, j: (0, 0)),    # embedding table (resident)
                pl.BlockSpec((tv, D), lambda i, j: (j, 0)),    # weight tile, (V, D) layout
                pl.BlockSpec((1, tv), lambda i, j: (0, j)),    # bias tile
            ],
            out_specs=pl.BlockSpec((tn, tv), lambda i, j: (i, j)),
            scratch_shapes=[pltpu.VMEM((tn, D), jnp.bfloat16)],
        ),
        compiler_params=pltpu.CompilerParams(
            dimension_semantics=("parallel", "arbitrary"),
            vmem_limit_bytes=32 * 1024 * 1024,
        ),
        cost_estimate=cost,
    )(idx_pad, emb_pad, w_pad, b_pad)

    return out[:N, :V].reshape(orig_shape + (V,))


if __name__ == "__main__":
    # Small, module-consistent shapes.
    vocab_size = 32
    embedding_dim = 128          # fixed at 128 by the module
    batch = 2
    context_window = 8           # x: (batch, context_window) int indices

    key = jax.random.PRNGKey(0)
    k_emb, k_w, k_b, k_x = jax.random.split(key, 4)

    # Deterministic parameter init (synthetic, not a checkpoint).
    embedding = jax.random.normal(k_emb, (vocab_size, embedding_dim),
                                  dtype=jnp.float32) * 0.1
    # padding_idx=0 -> zero that row, as nn.Embedding does at init.
    embedding = embedding.at[0].set(0.0)
    lin_w = jax.random.normal(k_w, (vocab_size, embedding_dim),
                              dtype=jnp.float32) * 0.05
    lin_b = jax.random.normal(k_b, (vocab_size,), dtype=jnp.float32) * 0.01

    # Integer token indices (include possible padding idx 0).
    x = jax.random.randint(k_x, (batch, context_window), 0, vocab_size,
                           dtype=jnp.int32)

    out = skip_forward(x, embedding, lin_w, lin_b)
    out = jax.block_until_ready(out)

    # Pure-JAX f32 reference (kernel runs the matmuls in bf16 with f32 accum).
    ref = jnp.take(embedding, x, axis=0) @ lin_w.T + lin_b
    assert out.shape == (batch, context_window, vocab_size)
    np.testing.assert_allclose(np.asarray(out), np.asarray(ref),
                               rtol=2e-2, atol=5e-3)

    print("KERNEL_OK")
</pallas_src>

<mosaic_0001>
module attributes {stable_mosaic.version = 11 : i64} {
  func.func @skip_kernel(%arg0: i32, %arg1: i32, %arg2: memref<128x1xi32, #tpu.memory_space<vmem>>, %arg3: memref<128x128xbf16, #tpu.memory_space<vmem>>, %arg4: memref<128x128xbf16, #tpu.memory_space<vmem>>, %arg5: memref<1x128xf32, #tpu.memory_space<vmem>>, %arg6: memref<128x128xf32, #tpu.memory_space<vmem>>, %arg7: memref<128x128xbf16, #tpu.memory_space<vmem>>) attributes {dimension_semantics = [#tpu.dimension_semantics<parallel>, #tpu.dimension_semantics<arbitrary>], iteration_bounds = array<i64: 1, 1>, scalar_prefetch = 0 : i64, scratch_operands = 1 : i64, tpu.core_type = #tpu.core_type<tc>, window_params = [{transform_indices = @transform_0, window_bounds = array<i64: 128, 1>}, {pipeline_mode = #tpu.pipeline_mode<synchronous>, transform_indices = @transform_1, window_bounds = array<i64: 128, 128>}, {transform_indices = @transform_2, window_bounds = array<i64: 128, 128>}, {transform_indices = @transform_3, window_bounds = array<i64: 1, 128>}, {transform_indices = @transform_4, window_bounds = array<i64: 128, 128>}]} {
    %c0_i32 = arith.constant 0 : i32
    %0 = arith.cmpi eq, %arg1, %c0_i32 : i32
    %1 = arith.extui %0 : i1 to i32
    %c0_i32_0 = arith.constant 0 : i32
    %2 = arith.cmpi ne, %1, %c0_i32_0 : i32
    scf.if %2 {
      %10 = tpu.iota {dimensions = array<i32: 1>} : vector<128x128xi32>
      %c0_8 = arith.constant 0 : index
      %c0_9 = arith.constant 0 : index
      %11 = vector.load %arg2[%c0_8, %c0_9] : memref<128x1xi32, #tpu.memory_space<vmem>>, vector<128x1xi32>
      %12 = vector.broadcast %11 : vector<128x1xi32> to vector<128x128xi32>
      %13 = arith.cmpi eq, %12, %10 : vector<128x128xi32>
      %14 = arith.extui %13 : vector<128x128xi1> to vector<128x128xi32>
      %15 = arith.sitofp %14 : vector<128x128xi32> to vector<128x128xf32>
      %16 = arith.truncf %15 : vector<128x128xf32> to vector<128x128xbf16>
      %c0_10 = arith.constant 0 : index
      %c0_11 = arith.constant 0 : index
      %17 = vector.load %arg3[%c0_10, %c0_11] : memref<128x128xbf16, #tpu.memory_space<vmem>>, vector<128x128xbf16>
      %cst_12 = arith.constant dense<0.000000e+00> : vector<128x128xf32>
      %18 = tpu.matmul %16, %17, %cst_12 {dimension_numbers = #tpu.dot_dimension_numbers<[1], [0], [0], [1], [0, 0, 1, 1], [], []>} : vector<128x128xbf16>, vector<128x128xbf16>, vector<128x128xf32> -> vector<128x128xf32>
      %19 = arith.truncf %18 : vector<128x128xf32> to vector<128x128xbf16>
      %c0_13 = arith.constant 0 : index
      %c0_14 = arith.constant 0 : index
      %20 = vector.load %arg7[%c0_13, %c0_14] : memref<128x128xbf16, #tpu.memory_space<vmem>>, vector<128x128xbf16>
      tpu.vector_store %arg7[%c0_13, %c0_14], %19 {strides = array<i32>} : memref<128x128xbf16, #tpu.memory_space<vmem>>, vector<128x128xbf16>,
    } else {
    }
    %c0 = arith.constant 0 : index
    %c0_1 = arith.constant 0 : index
    %3 = vector.load %arg7[%c0, %c0_1] : memref<128x128xbf16, #tpu.memory_space<vmem>>, vector<128x128xbf16>
    %c0_2 = arith.constant 0 : index
    %c0_3 = arith.constant 0 : index
    %4 = vector.load %arg4[%c0_2, %c0_3] : memref<128x128xbf16, #tpu.memory_space<vmem>>, vector<128x128xbf16>
    %cst = arith.constant dense<0.000000e+00> : vector<128x128xf32>
    %5 = tpu.matmul %3, %4, %cst {dimension_numbers = #tpu.dot_dimension_numbers<[1], [1], [0], [0], [0, 0, 1, 0], [], []>} : vector<128x128xbf16>, vector<128x128xbf16>, vector<128x128xf32> -> vector<128x128xf32>
    %c0_4 = arith.constant 0 : index
    %c0_5 = arith.constant 0 : index
    %6 = vector.load %arg5[%c0_4, %c0_5] : memref<1x128xf32, #tpu.memory_space<vmem>>, vector<1x128xf32>
    %7 = vector.broadcast %6 : vector<1x128xf32> to vector<128x128xf32>
    %8 = arith.addf %5, %7 : vector<128x128xf32>
    %c0_6 = arith.constant 0 : index
    %c0_7 = arith.constant 0 : index
    %9 = vector.load %arg6[%c0_6, %c0_7] : memref<128x128xf32, #tpu.memory_space<vmem>>, vector<128x128xf32>
    tpu.vector_store %arg6[%c0_6, %c0_7], %8 {strides = array<i32>} : memref<128x128xf32, #tpu.memory_space<vmem>>, vector<128x128xf32>,
    return
  }
  func.func @transform_0(%arg0: i32, %arg1: i32) -> (i32, i32) {
    %c0_i32 = arith.constant 0 : i32
    %c0_i32_0 = arith.constant 0 : i32
    return %arg0, %c0_i32 : i32, i32
  }
  func.func @transform_1(%arg0: i32, %arg1: i32) -> (i32, i32) {
    %c0_i32 = arith.constant 0 : i32
    %c0_i32_0 = arith.constant 0 : i32
    %c0_i32_1 = arith.constant 0 : i32
    return %c0_i32, %c0_i32_0 : i32, i32
  }
  func.func @transform_2(%arg0: i32, %arg1: i32) -> (i32, i32) {
    %c0_i32 = arith.constant 0 : i32
    %c0_i32_0 = arith.constant 0 : i32
    return %arg1, %c0_i32 : i32, i32
  }
  func.func @transform_3(%arg0: i32, %arg1: i32) -> (i32, i32) {
    %c0_i32 = arith.constant 0 : i32
    %c0_i32_0 = arith.constant 0 : i32
    return %c0_i32, %arg1 : i32, i32
  }
  func.func @transform_4(%arg0: i32, %arg1: i32) -> (i32, i32) {
    %c0_i32 = arith.constant 0 : i32
    return %arg0, %arg1 : i32, i32
  }
}

</mosaic_0001>

<bundles_post_ra>
// kernel: tpu_custom_call.1
= control target key start
LH: loop header
LB: loop body
LE: loop exit
PB: predicated region body
PF: predicated region fallthrough
CT: control target
= control target key end

     0   :  { %v762_v2 = vmov 0   ;;  %s894_s0 = inlined_call_operand.vmem [shape: s32[128,1], index: 0, kind: input, shape index: {}]   ;;  %s895_s1 = inlined_call_operand.vmem [shape: bf16[128,128], index: 1, kind: input, shape index: {}]   ;;  %s896_s2 = inlined_call_operand.vmem [shape: bf16[128,128], index: 2, kind: input, shape index: {}]   ;;  %s897_s3 = inlined_call_operand.vmem [shape: f32[1,128], index: 3, kind: input, shape index: {}]   ;;  %s898_s4 = inlined_call_operand.hbm [shape: f32[128,128], index: 4, kind: output, shape index: {}]  }
   0x1   :  { %v26_v0 = vld [vmem:[%s894_s0 + $0x10] sm:$0xff]  ;;  %v24_v1 = vld [vmem:[%s894_s0] sm:$0xff]  ;;  %733 = vset.pattern.permute.xlu1 %v762_v2  ;;  %732 = vset.pattern.permute.xlu0 %v762_v2 }
   0x2   :  { %47 = vperm.xlu1 %733, %v26_v0   ;;  %41 = vperm.xlu0 %732, %v24_v1   ;;  %v28_v3 = vld [vmem:[%s894_s0 + $0x20] sm:$0xff] }
   0x3   :  { %734 = vset.pattern.permute.xlu2 %v762_v2 }
   0x4   :  { %53 = vperm.xlu2 %734, %v28_v3  }
   0x5   :  { %9 = vsyncpa [#allocation4], 0  ;;  %v27_v4 = vld [vmem:[%s894_s0 + $0x18] sm:$0xff]  ;;  %v25_v5 = vld [vmem:[%s894_s0 + $0x8] sm:$0xff]  ;;  %v22_v27 = vlaneseq  ;;  %v763_v32 = vmov 1.0|1.0  }
   0x6   :  { %v29_v6 = vld [vmem:[%s894_s0 + $0x28] sm:$0xff]  ;;  %v639_v7 = vld [vmem:[%s895_s1 + $0x38] sm:$0xff]  ;;  %v638_v8 = vld [vmem:[%s895_s1 + $0x30] sm:$0xff]  ;;  %s492_s29 = sshll.u32 %s898_s4, 4  ;;  %s765_s30 = smov 128   ;;  %s493_s29 = int_to_ptr.hbm [resolvable:$true] %s492_s29 }
   0x7   :  { %208 = vmatpush.bf16.msra.mxu0 %v639_v7  ;;  %703 = vmatpush.bf16.msra.mxu3 %v639_v7  ;;  %v31_v9 = vld [vmem:[%s894_s0 + $0x38] sm:$0xff]  ;;  %v30_v10 = vld [vmem:[%s894_s0 + $0x30] sm:$0xff]  ;;  %v637_v11 = vld [vmem:[%s895_s1 + $0x28] sm:$0xff]  ;;  %v23_v29 = vand.u32 127, %v22_v27  ;;  %s766_s5 = smov 8  }
   0x8   :  { %v34_v12 = vld [vmem:[%s894_s0 + $0x50] sm:$0xff]  ;;  %v636_v13 = vld [vmem:[%s895_s1 + $0x20] sm:$0xff]  ;;  %v35_v15 = vld [vmem:[%s894_s0 + $0x58] sm:$0xff] }
   0x9   :  { %v32_v14 = vld [vmem:[%s894_s0 + $0x40] sm:$0xff]  ;;  %v635_v16 = vld [vmem:[%s895_s1 + $0x18] sm:$0xff]  ;;  %v33_v17 = vld [vmem:[%s894_s0 + $0x48] sm:$0xff] }
   0xa   :  { %50 = vperm.xlu1 %733, %v27_v4   ;;  %44 = vperm.xlu0 %732, %v25_v5   ;;  %v634_v18 = vld [vmem:[%s895_s1 + $0x10] sm:$0xff]  ;;  %v37_v19 = vld [vmem:[%s894_s0 + $0x68] sm:$0xff]  ;;  %v36_v20 = vld [vmem:[%s894_s0 + $0x60] sm:$0xff] }
   0xb   :  { %209 = vmatpush.bf16.msra.mxu0 %v638_v8  ;;  %704 = vmatpush.bf16.msra.mxu3 %v638_v8  ;;  %v38_v21 = vld [vmem:[%s894_s0 + $0x70] sm:$0xff]  ;;  %v39_v22 = vld [vmem:[%s894_s0 + $0x78] sm:$0xff]  ;;  %v633_v23 = vld [vmem:[%s895_s1 + $0x8] sm:$0xff] }
   0xc   :  { %56 = vperm.xlu2 %734, %v29_v6   ;;  %v632_v24 = vld [vmem:[%s895_s1] sm:$0xff]  ;;  %v655_v41 = vld [vmem:[%s896_s2 + $0x38] sm:$0xff]  ;;  %v654_v43 = vld [vmem:[%s896_s2 + $0x30] sm:$0xff] }
   0xd   :  { %421 = vmatpush.bf16.xpose.msra.mxu1 %v655_v41  ;;  %711 = vmatpush.bf16.xpose.msra.mxu2 %v655_v41  ;;  %v653_v46 = vld [vmem:[%s896_s2 + $0x28] sm:$0xff]  ;;  %v652_v47 = vld [vmem:[%s896_s2 + $0x20] sm:$0xff]  ;;  %v651_v48 = vld [vmem:[%s896_s2 + $0x18] sm:$0xff] }
   0xe   :  { %v650_v49 = vld [vmem:[%s896_s2 + $0x10] sm:$0xff]  ;;  %v649_v50 = vld [vmem:[%s896_s2 + $0x8] sm:$0xff]  ;;  %v648_v51 = vld [vmem:[%s896_s2] sm:$0xff] }
   0xf   :  { %210 = vmatpush.bf16.msra.mxu0 %v637_v11  ;;  %705 = vmatpush.bf16.msra.mxu3 %v637_v11 }
  0x12   :  { %62 = vperm.xlu1 %733, %v31_v9   ;;  %59 = vperm.xlu0 %732, %v30_v10  }
  0x13   :  { %211 = vmatpush.bf16.msra.mxu0 %v636_v13  ;;  %706 = vmatpush.bf16.msra.mxu3 %v636_v13 }
  0x14   :  { %71 = vperm.xlu2 %734, %v34_v12  }
  0x15   :  { %422 = vmatpush.bf16.xpose.msra.mxu1 %v654_v43  ;;  %713 = vmatpush.bf16.xpose.msra.mxu2 %v654_v43 }
  0x17   :  { %212 = vmatpush.bf16.msra.mxu0 %v635_v16  ;;  %707 = vmatpush.bf16.msra.mxu3 %v635_v16 }
  0x1a   :  { %65 = vperm.xlu1 %733, %v32_v14   ;;  %74 = vperm.xlu0 %732, %v35_v15  }
  0x1b   :  { %213 = vmatpush.bf16.msra.mxu0 %v634_v18  ;;  %708 = vmatpush.bf16.msra.mxu3 %v634_v18 }
  0x1c   :  { %68 = vperm.xlu2 %734, %v33_v17  }
  0x1d   :  { %423 = vmatpush.bf16.xpose.msra.mxu1 %v653_v46  ;;  %715 = vmatpush.bf16.xpose.msra.mxu2 %v653_v46 }
  0x1f   :  { %214 = vmatpush.bf16.msra.mxu0 %v633_v23  ;;  %709 = vmatpush.bf16.msra.mxu3 %v633_v23 }
  0x22   :  { %80 = vperm.xlu1 %733, %v37_v19   ;;  %77 = vperm.xlu0 %732, %v36_v20   ;;  %v735_v20 = vld [vmem:[%s897_s3] ss:$0 sm:$0xff]  ;;  %s764_s3 = smov [#allocation3]  }
  0x23   :  { %215 = vmatpush.bf16.msra.mxu0 %v632_v24  ;;  %710 = vmatpush.bf16.msra.mxu3 %v632_v24  ;;  %s490_s26 = sshll.u32 %s764_s3, 4  ;;  %s491_s26 = int_to_ptr.vmem [resolvable:$true] %s490_s26 }
  0x24   :  { %83 = vperm.xlu2 %734, %v38_v21  }
  0x25   :  { %424 = vmatpush.bf16.xpose.msra.mxu1 %v652_v47  ;;  %717 = vmatpush.bf16.xpose.msra.mxu2 %v652_v47 }
  0x27   :  { %712 = vmatpush.bf16.xpose.msrb.mxu3 %v655_v41 }
  0x2a   :  { %86 = vperm.xlu0 %732, %v39_v22  }
  0x2d   :  { %425 = vmatpush.bf16.xpose.msra.mxu1 %v651_v48  ;;  %719 = vmatpush.bf16.xpose.msra.mxu2 %v651_v48 }
  0x2f   :  { %714 = vmatpush.bf16.xpose.msrb.mxu3 %v654_v43 }
  0x35   :  { %426 = vmatpush.bf16.xpose.msra.mxu1 %v650_v49  ;;  %721 = vmatpush.bf16.xpose.msra.mxu2 %v650_v49 }
  0x37   :  { %716 = vmatpush.bf16.xpose.msrb.mxu3 %v653_v46 }
  0x3d   :  { %427 = vmatpush.bf16.xpose.msra.mxu1 %v649_v50  ;;  %723 = vmatpush.bf16.xpose.msra.mxu2 %v649_v50 }
  0x3f   :  { %718 = vmatpush.bf16.xpose.msrb.mxu3 %v652_v47 }
  0x45   :  { %428 = vmatpush.bf16.xpose.msra.mxu1 %v648_v51  ;;  %725 = vmatpush.bf16.xpose.msra.mxu2 %v648_v51 }
  0x47   :  { %720 = vmatpush.bf16.xpose.msrb.mxu3 %v651_v48 }
  0x4f   :  { %722 = vmatpush.bf16.xpose.msrb.mxu3 %v650_v49 }
  0x57   :  { %724 = vmatpush.bf16.xpose.msrb.mxu3 %v649_v50 }
  0x5e   :  { %v54_v28 = vpop.permute.xlu2 %53 }
  0x5f   :  { %vm92_vm9 = vcmp.eq.s32.totalorder %v54_v28, %v23_v29  ;;  %726 = vmatpush.bf16.xpose.msrb.mxu3 %v648_v51 }
  0x66   :  { %v57_v33 = vpop.permute.xlu2 %56 }
  0x67   :  { %vm93_vm10 = vcmp.eq.s32.totalorder %v57_v33, %v23_v29 }
  0x68   :  { %vm556_vm13 = vmpackc.low %vm93_vm10, %vm92_vm9 }
  0x6e   :  { %v72_v36 = vpop.permute.xlu2 %71 }
  0x6f   :  { %vm98_vm5 = vcmp.eq.s32.totalorder %v72_v36, %v23_v29 }
  0x74   :  { %v48_v25 = vpop.permute.xlu1 %47  ;;  %v42_v26 = vpop.permute.xlu0 %41 }
  0x75   :  { %vm88_vm1 = vcmp.eq.s32.totalorder %v42_v26, %v23_v29  ;;  %vm90_vm3 = vcmp.eq.s32.totalorder %v48_v25, %v23_v29 }
  0x76   :  { %v69_v42 = vpop.permute.xlu2 %68 }
  0x7c   :  { %v51_v30 = vpop.permute.xlu1 %50  ;;  %v45_v31 = vpop.permute.xlu0 %44 }
  0x7d   :  { %vm89_vm0 = vcmp.eq.s32.totalorder %v45_v31, %v23_v29  ;;  %vm91_vm4 = vcmp.eq.s32.totalorder %v51_v30, %v23_v29 }
  0x7e   :  { %vm552_vm2 = vmpackc.low %vm89_vm0, %vm88_vm1  ;;  %v84_v45 = vpop.permute.xlu2 %83 }
  0x7f   :  { %553 = vmatmul.msk.bf16.vlgmr.msra.gmra.mxu0 %vm552_vm2, %v763_v32  ;;  %vm554_vm7 = vmpackc.low %vm91_vm4, %vm90_vm3  ;;  %vm102_vm3 = vcmp.eq.s32.totalorder %v84_v45, %v23_v29 }
  0x84   :  { %v60_v34 = vpop.permute.xlu0 %59  ;;  %v63_v35 = vpop.permute.xlu1 %62 }
  0x85   :  { %vm95_vm15 = vcmp.eq.s32.totalorder %v63_v35, %v23_v29  ;;  %vm94_vm0 = vcmp.eq.s32.totalorder %v60_v34, %v23_v29 }
  0x86   :  { %vm558_vm2 = vmpackc.low %vm95_vm15, %vm94_vm0 }
  0x8c   :  { %v75_v37 = vpop.permute.xlu0 %74  ;;  %v66_v38 = vpop.permute.xlu1 %65 }
  0x8d   :  { %vm99_vm6 = vcmp.eq.s32.totalorder %v75_v37, %v23_v29 }
  0x8e   :  { %vm562_vm8 = vmpackc.low %vm99_vm6, %vm98_vm5  ;;  %vm97_vm5 = vcmp.eq.s32.totalorder %v69_v42, %v23_v29  ;;  %vm96_vm6 = vcmp.eq.s32.totalorder %v66_v38, %v23_v29 }
  0x8f   :  { %555 = vmatmul.msk.bf16.gmra.mxu0 %vm554_vm7, %v763_v32  ;;  %563 = vmatmul.msk.bf16.vlgmr.msra.gmra.mxu3 %vm562_vm8, %v763_v32  ;;  %vm560_vm7 = vmpackc.low %vm97_vm5, %vm96_vm6 }
  0x94   :  { %v81_v39 = vpop.permute.xlu1 %80  ;;  %v78_v40 = vpop.permute.xlu0 %77 }
  0x95   :  { %vm101_vm11 = vcmp.eq.s32.totalorder %v81_v39, %v23_v29  ;;  %vm100_vm12 = vcmp.eq.s32.totalorder %v78_v40, %v23_v29 }
  0x96   :  { %vm564_vm14 = vmpackc.low %vm101_vm11, %vm100_vm12 }
  0x9c   :  { %v87_v44 = vpop.permute.xlu0 %86 }
  0x9d   :  { %vm103_vm1 = vcmp.eq.s32.totalorder %v87_v44, %v23_v29 }
  0x9e   :  { %vm566_vm4 = vmpackc.low %vm103_vm1, %vm102_vm3 }
  0x9f   :  { %557 = vmatmul.msk.bf16.gmra.mxu0 %vm556_vm13, %v763_v32  ;;  %565 = vmatmul.msk.bf16.gmra.mxu3 %vm564_vm14, %v763_v32 }
  0xaf   :  { %559 = vmatmul.msk.bf16.gmra.mxu0 %vm558_vm2, %v763_v32  ;;  %567 = vmatmul.msk.bf16.gmra.mxu3 %vm566_vm4, %v763_v32 }
  0xbf   :  { %561 = vmatmul.msk.bf16.gmra.mxu0 %vm560_vm7, %v763_v32 }
  0xfc   :  { %v217_v52 = vpop.f32.mrf.mxu0 }
 0x104   :  { %v219_v53 = vpop.f32.mrf.mxu0 }
 0x105   :  { %v659_v54 = vpack.c.bf16 %v219_v53, %v217_v52 }
 0x107   :  { %660 = vst [vmem:[#allocation2 + $0x30] sm:$0xff] %v659_v54  }
 0x10c   :  { %v222_v55 = vpop.f32.mrf.mxu0 }
 0x10e   :  { %v640_v56 = vld [vmem:[#allocation2 + $0x30] sm:$0xff] }
 0x10f   :  { %429 = vmatmul.bf16.vlgmr.msra.gmra.mxu1 %v640_v56 }
 0x112   :  { %v242_v57 = vpop.f32.mrf.mxu3 }
 0x114   :  { %v224_v58 = vpop.f32.mrf.mxu0 }
 0x115   :  { %v664_v59 = vpack.c.bf16 %v224_v58, %v222_v55 }
 0x117   :  { %696 = vst [vmem:[#allocation2] sm:$0xff] %v664_v59  }
 0x11a   :  { %v244_v60 = vpop.f32.mrf.mxu3 }
 0x11b   :  { %v684_v61 = vpack.c.bf16 %v244_v60, %v242_v57 }
 0x11c   :  { %v227_v62 = vpop.f32.mrf.mxu0 }
 0x11d   :  { %700 = vst [vmem:[#allocation2 + $0x20] sm:$0xff] %v684_v61  }
 0x11e   :  { %v641_v63 = vld [vmem:[#allocation2] sm:$0xff] }
 0x11f   :  { %434 = vmatmul.bf16.gmra.mxu1 %v641_v63 }
 0x122   :  { %v247_v0 = vpop.f32.mrf.mxu3 }
 0x124   :  { %v229_v1 = vpop.f32.mrf.mxu0  ;;  %v645_v18 = vld [vmem:[#allocation2 + $0x20] sm:$0xff] }
 0x125   :  { %v669_v2 = vpack.c.bf16 %v229_v1, %v227_v62 }
 0x127   :  { %697 = vst [vmem:[#allocation2 + $0x18] sm:$0xff] %v669_v2  }
 0x12a   :  { %v249_v3 = vpop.f32.mrf.mxu3 }
 0x12b   :  { %v689_v4 = vpack.c.bf16 %v249_v3, %v247_v0 }
 0x12c   :  { %v232_v5 = vpop.f32.mrf.mxu0 }
 0x12d   :  { %701 = vst [vmem:[#allocation2 + $0x28] sm:$0xff] %v689_v4  }
 0x12e   :  { %v642_v6 = vld [vmem:[#allocation2 + $0x18] sm:$0xff] }
 0x12f   :  { %439 = vmatmul.bf16.gmra.mxu1 %v642_v6 }
 0x132   :  { %v252_v7 = vpop.f32.mrf.mxu3 }
 0x134   :  { %v234_v8 = vpop.f32.mrf.mxu0  ;;  %v646_v19 = vld [vmem:[#allocation2 + $0x28] sm:$0xff] }
 0x135   :  { %v674_v9 = vpack.c.bf16 %v234_v8, %v232_v5 }
 0x137   :  { %698 = vst [vmem:[#allocation2 + $0x10] sm:$0xff] %v674_v9  }
 0x13a   :  { %v254_v10 = vpop.f32.mrf.mxu3 }
 0x13b   :  { %v694_v11 = vpack.c.bf16 %v254_v10, %v252_v7 }
 0x13c   :  { %v237_v12 = vpop.f32.mrf.mxu0 }
 0x13d   :  { %702 = vst [vmem:[#allocation2 + $0x38] sm:$0xff] %v694_v11  }
 0x13e   :  { %v643_v13 = vld [vmem:[#allocation2 + $0x10] sm:$0xff] }
 0x13f   :  { %444 = vmatmul.bf16.vlgmr.msra.gmra.mxu2 %v643_v13 }
 0x144   :  { %v239_v14 = vpop.f32.mrf.mxu0  ;;  %v647_v15 = vld [vmem:[#allocation2 + $0x38] sm:$0xff] }
 0x145   :  { %v679_v16 = vpack.c.bf16 %v239_v14, %v237_v12  ;;  %464 = vmatmul.bf16.vlgmr.msrb.gmra.mxu3 %v647_v15 }
 0x147   :  { %699 = vst [vmem:[#allocation2 + $0x8] sm:$0xff] %v679_v16  }
 0x14e   :  { %v644_v17 = vld [vmem:[#allocation2 + $0x8] sm:$0xff] }
 0x14f   :  { %449 = vmatmul.bf16.gmra.mxu2 %v644_v17 }
 0x15f   :  { %454 = vmatmul.bf16.gmra.mxu2 %v645_v18 }
 0x16f   :  { %459 = vmatmul.bf16.gmra.mxu2 %v646_v19 }
 0x18c   :  { %v430_v21 = vpop.f32.mrf.mxu1 }
 0x18d   :  { %v431_v22 = vadd.f32 %v735_v20, %v430_v21 }
 0x18f   :  { %470 = vst [vmem:[#allocation3] sm:$0xff] %v431_v22 }
 0x194   :  { %v432_v23 = vpop.f32.mrf.mxu1 }
 0x195   :  { %v433_v24 = vadd.f32 %v735_v20, %v432_v23 }
 0x197   :  { %471 = vst [vmem:[#allocation3 + $0x8] sm:$0xff] %v433_v24 }
 0x19c   :  { %v435_v25 = vpop.f32.mrf.mxu1 }
 0x19d   :  { %v436_v26 = vadd.f32 %v735_v20, %v435_v25 }
 0x19f   :  { %472 = vst [vmem:[#allocation3 + $0x10] sm:$0xff] %v436_v26 }
 0x1a4   :  { %v437_v27 = vpop.f32.mrf.mxu1 }
 0x1a5   :  { %v438_v28 = vadd.f32 %v735_v20, %v437_v27 }
 0x1a7   :  { %473 = vst [vmem:[#allocation3 + $0x18] sm:$0xff] %v438_v28 }
 0x1ac   :  { %v440_v29 = vpop.f32.mrf.mxu1 }
 0x1ad   :  { %v441_v30 = vadd.f32 %v735_v20, %v440_v29 }
 0x1af   :  { %474 = vst [vmem:[#allocation3 + $0x20] sm:$0xff] %v441_v30 }
 0x1b4   :  { %v442_v31 = vpop.f32.mrf.mxu1 }
 0x1b5   :  { %v443_v32 = vadd.f32 %v735_v20, %v442_v31 }
 0x1b7   :  { %475 = vst [vmem:[#allocation3 + $0x28] sm:$0xff] %v443_v32 }
 0x1c2   :  { %v445_v33 = vpop.f32.mrf.mxu2 }
 0x1c3   :  { %v446_v34 = vadd.f32 %v735_v20, %v445_v33 }
 0x1c5   :  { %476 = vst [vmem:[#allocation3 + $0x30] sm:$0xff] %v446_v34 }
 0x1c8   :  { %v465_v35 = vpop.f32.mrf.mxu3 }
 0x1c9   :  { %v466_v36 = vadd.f32 %v735_v20, %v465_v35 }
 0x1ca   :  { %v447_v37 = vpop.f32.mrf.mxu2 }
 0x1cb   :  { %484 = vst [vmem:[#allocation3 + $0x70] sm:$0xff] %v466_v36  ;;  %v448_v38 = vadd.f32 %v735_v20, %v447_v37 }
 0x1cd   :  { %477 = vst [vmem:[#allocation3 + $0x38] sm:$0xff] %v448_v38 }
 0x1d0   :  { %v467_v39 = vpop.f32.mrf.mxu3 }
 0x1d1   :  { %v468_v40 = vadd.f32 %v735_v20, %v467_v39 }
 0x1d2   :  { %v450_v41 = vpop.f32.mrf.mxu2 }
 0x1d3   :  { %485 = vst [vmem:[#allocation3 + $0x78] sm:$0xff] %v468_v40  ;;  %v451_v42 = vadd.f32 %v735_v20, %v450_v41 }
 0x1d5   :  { %478 = vst [vmem:[#allocation3 + $0x40] sm:$0xff] %v451_v42 }
 0x1da   :  { %v452_v43 = vpop.f32.mrf.mxu2 }
 0x1db   :  { %v453_v44 = vadd.f32 %v735_v20, %v452_v43 }
 0x1dd   :  { %479 = vst [vmem:[#allocation3 + $0x48] sm:$0xff] %v453_v44 }
 0x1e2   :  { %v455_v45 = vpop.f32.mrf.mxu2 }
 0x1e3   :  { %v456_v46 = vadd.f32 %v735_v20, %v455_v45 }
 0x1e5   :  { %480 = vst [vmem:[#allocation3 + $0x50] sm:$0xff] %v456_v46 }
 0x1ea   :  { %v457_v47 = vpop.f32.mrf.mxu2 }
 0x1eb   :  { %v458_v48 = vadd.f32 %v735_v20, %v457_v47 }
 0x1ed   :  { %481 = vst [vmem:[#allocation3 + $0x58] sm:$0xff] %v458_v48 }
 0x1f2   :  { %v460_v49 = vpop.f32.mrf.mxu2 }
 0x1f3   :  { %v461_v50 = vadd.f32 %v735_v20, %v460_v49 }
 0x1f5   :  { %482 = vst [vmem:[#allocation3 + $0x60] sm:$0xff] %v461_v50 }
 0x1fa   :  { %v462_v51 = vpop.f32.mrf.mxu2 }
 0x1fb   :  { %v463_v52 = vadd.f32 %v735_v20, %v462_v51 }
 0x1fd   :  { %483 = vst [vmem:[#allocation3 + $0x68] sm:$0xff] %v463_v52 }
 0x1fe   :  { %498 = dma.vmem_to_hbm [thread:$0]  %s491_s26, 2048, %s493_s29, [#allocation4], %s765_s30, %s765_s30, %s766_s5  }
 0x1ff   :  { %760 = dma.done.wait [#allocation4], 2048  }
 0x200   :  { %761 = vsyncadd [#allocation4], 4294965248 }
 0x201   :  { %503 = vsyncpa [#allocation4], 1 }

</bundles_post_ra>
